<compile_context>
chip_gen: v5e
topology: v5e:2x2
jax: 0.10.0
libtpu: 0.0.40
codegen_flags: <defaults>
</compile_context>

<pallas_src>
import functools
import math

import jax
import jax.numpy as jnp
from jax import lax
from jax.experimental import pallas as pl
from jax.experimental.pallas import tpu as pltpu


# ---------------------------------------------------------------------------
# Constants / helpers
# ---------------------------------------------------------------------------
_LANE = 128
_SUBLANE = 8
_V_CHUNK = 512                 # vocabulary slice width for the one-hot MXU path
_DMA_DEPTH = 32                # outstanding row DMAs in the HBM gather ring
_MIN_PALLAS_N = 64             # below this plain jnp.take wins on call overhead
_MAX_ROWS_PER_CALL = 65536     # bounds SMEM used by scalar-prefetched indices
_TARGET_BLOCK_BYTES = 1 << 20  # ~1 MiB output blocks (near HBM roofline)


def _round_up(x: int, m: int) -> int:
    return ((x + m - 1) // m) * m


def _vmem_capacity_bytes() -> int:
    """Physical VMEM of the local chip; conservative (v7x-safe) fallback."""
    try:
        return int(pltpu.get_tpu_info().vmem_capacity_bytes)
    except Exception:
        return 64 * 1024 * 1024


def _pick_tq(n: int, row_bytes: int) -> int:
    """Rows gathered per grid step.

    Targets a ~1 MiB per-step footprint (85%+ of HBM roofline), keeps the
    block sublane-aligned, and guarantees at least two grid blocks so v7x's
    two TensorCores can split the (parallel) grid axis.
    """
    tq = max(_SUBLANE, min(1024, _TARGET_BLOCK_BYTES // max(row_bytes, 1)))
    if n >= 2 * _SUBLANE:
        tq = min(tq, (n + 1) // 2)     # >= 2 blocks for megacore
    else:
        tq = min(tq, max(n, 1))
    return _round_up(tq, _SUBLANE)


# ---------------------------------------------------------------------------
# Path A: small vocabulary -> one-hot MXU gather, vocabulary streamed in chunks
# ---------------------------------------------------------------------------
def _onehot_gather_kernel(idx_ref, w_ref, o_ref, acc_ref):
    # idx_ref: (TQ, 1) int32 block of indices (VMEM)
    # w_ref:   (V_CHUNK, D_pad) vocabulary slice (double-buffered, streamed)
    # o_ref:   (TQ, D_pad) dense, lane-aligned output block
    # acc_ref: (TQ, D_pad) f32 accumulator persisting across the vocab axis
    j = pl.program_id(1)
    tq = o_ref.shape[0]
    v_chunk = w_ref.shape[0]

    @pl.when(j == 0)
    def _init():
        acc_ref[...] = jnp.zeros_like(acc_ref)

    # (tq, v_chunk) one-hot against this vocabulary slice only -> small temp,
    # no V-sized spill per step.
    col = lax.broadcasted_iota(jnp.int32, (tq, v_chunk), 1) + j * v_chunk
    one_hot = (col == idx_ref[...]).astype(w_ref.dtype)
    acc_ref[...] += jnp.dot(one_hot, w_ref[...],
                            preferred_element_type=jnp.float32)

    @pl.when(j == pl.num_programs(1) - 1)
    def _finalize():
        o_ref[...] = acc_ref[...].astype(o_ref.dtype)


def _gather_onehot(weight: jax.Array, idx_flat: jax.Array, tq: int) -> jax.Array:
    v, d = weight.shape
    itemsize = jnp.dtype(weight.dtype).itemsize
    d_pad = _round_up(d, _LANE)
    v_chunk = min(_V_CHUNK, _round_up(v, _SUBLANE))
    v_pad = _round_up(v, v_chunk)
    if d_pad != d or v_pad != v:
        # Small table by construction (path gate) -> padding is cheap; gives
        # lane-dense outputs and sublane-aligned vocab chunks.
        weight = jnp.pad(weight, ((0, v_pad - v), (0, d_pad - d)))

    n = idx_flat.shape[0]            # multiple of tq
    nb = n // tq
    nv = v_pad // v_chunk
    idx2d = idx_flat.reshape(n, 1)

    flops = 2 * n * v_pad * d_pad
    bytes_accessed = (nb * v_pad * d_pad + n * d_pad) * itemsize + n * 4
    vmem_need = (2 * (tq * d_pad + v_chunk * d_pad) * itemsize   # dbl-buffered blocks
                 + 2 * tq * 4                                    # index blocks
                 + tq * d_pad * 4                                # f32 accumulator
                 + tq * v_chunk * (4 + itemsize)                 # one-hot temps
                 + (1 << 20))
    vmem_limit = int(min(0.9 * _vmem_capacity_bytes(), max(vmem_need, 16 << 20)))

    grid_spec = pltpu.PrefetchScalarGridSpec(
        num_scalar_prefetch=0,
        grid=(nb, nv),
        in_specs=[
            pl.BlockSpec((tq, 1), lambda i, j: (i, 0)),          # index block
            pl.BlockSpec((v_chunk, d_pad), lambda i, j: (j, 0)),  # vocab slice
        ],
        out_specs=pl.BlockSpec((tq, d_pad), lambda i, j: (i, 0)),
        scratch_shapes=[pltpu.VMEM((tq, d_pad), jnp.float32)],
    )
    out = pl.pallas_call(
        _onehot_gather_kernel,
        out_shape=jax.ShapeDtypeStruct((n, d_pad), weight.dtype),
        grid_spec=grid_spec,
        compiler_params=pltpu.CompilerParams(
            dimension_semantics=("parallel", "arbitrary"),
            vmem_limit_bytes=vmem_limit,
        ),
        cost_estimate=pl.CostEstimate(
            flops=flops, transcendentals=0, bytes_accessed=bytes_accessed),
    )(idx2d, weight)
    return out[:, :d]


# ---------------------------------------------------------------------------
# Path B: table in HBM, rows DMA'd directly into the output block
# ---------------------------------------------------------------------------
def _hbm_gather_kernel(idx_ref, w_hbm, o_ref, sems, *, tq, depth):
    # idx_ref: (rows,) int32 in SMEM (scalar prefetch; wrapper bounds `rows`)
    # w_hbm:   (V, D_pad) table left in HBM (memory_space=pl.ANY)
    # o_ref:   (TQ, D_pad) output block -- rows are DMA'd straight into it
    # sems:    ring of `depth` DMA semaphores
    base = pl.program_id(0) * tq

    def _start(r, row):
        pltpu.make_async_copy(
            w_hbm.at[row], o_ref.at[r], sems.at[r % depth]
        ).start()

    def _wait(r):
        # Placeholder source row 0: every row transfer moves identical bytes,
        # and .wait() only needs the byte count + semaphore slot.
        pltpu.make_async_copy(
            w_hbm.at[0], o_ref.at[r], sems.at[r % depth]
        ).wait()

    # Prime `depth` outstanding DMAs (each sem slot carries at most one DMA).
    for r in range(depth):
        _start(r, idx_ref[base + r])

    def _body(r, carry):
        nxt = idx_ref[base + r + depth]   # scalar read hoisted above the wait
        _wait(r)
        _start(r + depth, nxt)
        return carry

    lax.fori_loop(0, tq - depth, _body, 0, unroll=8)

    # Drain the ring.
    for r in range(tq - depth, tq):
        _wait(r)


def _gather_hbm(weight_padded: jax.Array, idx_flat: jax.Array, tq: int) -> jax.Array:
    v, d_pad = weight_padded.shape
    itemsize = jnp.dtype(weight_padded.dtype).itemsize
    n = idx_flat.shape[0]            # multiple of tq
    nb = n // tq
    depth = min(_DMA_DEPTH, tq)

    bytes_accessed = 2 * n * d_pad * itemsize + n * 4
    vmem_need = 2 * tq * d_pad * itemsize + (1 << 20)   # double-buffered output
    vmem_limit = int(min(0.9 * _vmem_capacity_bytes(), max(vmem_need, 16 << 20)))

    kernel = functools.partial(_hbm_gather_kernel, tq=tq, depth=depth)
    grid_spec = pltpu.PrefetchScalarGridSpec(
        num_scalar_prefetch=1,
        grid=(nb,),
        in_specs=[pl.BlockSpec(memory_space=pl.ANY)],      # raw HBM table
        out_specs=pl.BlockSpec((tq, d_pad), lambda i, idx: (i, 0)),
        scratch_shapes=[pltpu.SemaphoreType.DMA((depth,))],
    )
    return pl.pallas_call(
        kernel,
        out_shape=jax.ShapeDtypeStruct((n, d_pad), weight_padded.dtype),
        grid_spec=grid_spec,
        compiler_params=pltpu.CompilerParams(
            dimension_semantics=("parallel",),
            vmem_limit_bytes=vmem_limit,
        ),
        cost_estimate=pl.CostEstimate(
            flops=0, transcendentals=0, bytes_accessed=bytes_accessed),
    )(idx_flat, weight_padded)


def _gather_hbm_chunked(weight: jax.Array, idx_flat: jax.Array, tq: int) -> jax.Array:
    v, d = weight.shape
    d_pad = _round_up(d, _LANE)
    if d_pad != d:
        # Lane-dense rows: aligned per-row DMA destinations + unmasked writeback.
        # TODO(synk): cache the padded table across calls for very large V so the
        # per-call pad does not re-stream the whole table through HBM.
        weight = jnp.pad(weight, ((0, 0), (0, d_pad - d)))

    n = idx_flat.shape[0]            # multiple of tq
    rows_per_call = tq * max(1, _MAX_ROWS_PER_CALL // tq)
    if n <= rows_per_call:
        out = _gather_hbm(weight, idx_flat, tq)
    else:
        # Bound the scalar-prefetched index vector (1-D SMEM pads to
        # next_pow2(4N) bytes) by splitting huge batches across pallas_calls.
        parts = [
            _gather_hbm(weight, idx_flat[s:s + rows_per_call], tq)
            for s in range(0, n, rows_per_call)
        ]
        out = jnp.concatenate(parts, axis=0)
    return out[:, :d]


# ---------------------------------------------------------------------------
# Top-level gather wrapper (path selection is static: shapes / dtypes only)
# ---------------------------------------------------------------------------
@functools.partial(jax.jit, static_argnames=("force_hbm",))
def embedding_gather(weight: jax.Array, flat_indices: jax.Array, *,
                     force_hbm: bool = False) -> jax.Array:
    """Gather rows of `weight` (V, D) at `flat_indices` (n,) -> (n, D)."""
    v, d = weight.shape
    n = flat_indices.shape[0]
    itemsize = jnp.dtype(weight.dtype).itemsize
    d_pad = _round_up(d, _LANE)

    # Clamp: out-of-range ids would otherwise read wrong HBM rows (torch raises;
    # this is a documented semantic deviation, not a numeric one for valid ids).
    idx = jnp.clip(flat_indices.astype(jnp.int32), 0, v - 1)

    # One-hot MXU path only when the wasted FLOPs stay cheap: tighter cap for
    # f32 tables (v5e's f32 MXU is slow) and a small re-streamed table.
    onehot_vocab_cap = 1024 if itemsize >= 4 else 2048
    table_bytes = _round_up(v, _SUBLANE) * d_pad * itemsize
    use_onehot = ((not force_hbm)
                  and v <= onehot_vocab_cap
                  and table_bytes <= (4 << 20))

    # Per-row footprint used to size the block (~1 MiB per step): Path A also
    # carries an f32 accumulator and the (tq, v_chunk) one-hot temporaries.
    if use_onehot:
        row_bytes = d_pad * (itemsize + 4) + _V_CHUNK * 4
    else:
        row_bytes = d_pad * itemsize
    tq = _pick_tq(n, row_bytes)

    n_pad = _round_up(n, tq)
    if n_pad != n:
        idx = jnp.pad(idx, (0, n_pad - n))   # padded rows fetch row 0, sliced off

    if use_onehot:
        out = _gather_onehot(weight, idx, tq)
    else:
        out = _gather_hbm_chunked(weight, idx, tq)
    return out[:n]


# ---------------------------------------------------------------------------
# Module wrapper (pykeen Embedding, default configuration)
# ---------------------------------------------------------------------------
class PallasEmbedding:
    """Minimal JAX/Pallas port of pykeen Embedding (default init, no
    normalizer / constrainer / regularizer)."""

    def __init__(self, num_embeddings: int, embedding_dim=None, shape=None,
                 key=None, dtype=jnp.float32):
        if embedding_dim is None and shape is None:
            raise ValueError("Missing both, shape and embedding_dim")
        if shape is None:
            shape = (embedding_dim,)
        elif isinstance(shape, int):
            shape = (shape,)
        else:
            shape = tuple(shape)
        self.max_id = num_embeddings
        self.shape = shape
        self.embedding_dim = int(math.prod(shape))
        if key is None:
            key = jax.random.PRNGKey(0)
        # Default pykeen initializer is torch.nn.init.normal_ (mean=0, std=1).
        self.weight = jax.random.normal(
            key, (num_embeddings, self.embedding_dim), dtype=dtype
        )
        # TODO(synk): normalizer / regularizer / constrainer hooks are None by
        # default in the reference module and are not implemented here.

    def forward(self, indices=None) -> jax.Array:
        if indices is None:
            # x = self._embeddings.weight ; view(max_id, *shape)
            return self.weight.reshape((self.max_id,) + self.shape)
        prefix_shape = indices.shape
        flat = indices.reshape(-1).astype(jnp.int32)
        if flat.shape[0] < _MIN_PALLAS_N:
            # Fixed pallas_call / grid overhead exceeds the work for tiny batches.
            x = jnp.take(self.weight, jnp.clip(flat, 0, self.max_id - 1), axis=0)
        else:
            x = embedding_gather(self.weight, flat)
        # x.view(*prefix_shape, *self.shape)
        return x.reshape(prefix_shape + self.shape)

    __call__ = forward


# ---------------------------------------------------------------------------
# Self-test
# ---------------------------------------------------------------------------
if __name__ == "__main__":
    key = jax.random.PRNGKey(0)
    wkey, ikey, wkey2, ikey2 = jax.random.split(key, 4)

    # Case 1: small vocabulary (one-hot MXU path), 2-D indices as in sLCWA
    # scoring: (batch=8, num=16) -> n=128, V=64, D=128.
    num_embeddings, embedding_dim = 64, 128
    emb = PallasEmbedding(num_embeddings, embedding_dim=embedding_dim, key=wkey)
    indices = jax.random.randint(ikey, (8, 16), 0, num_embeddings, dtype=jnp.int32)
    out = jax.block_until_ready(emb(indices))
    ref = jnp.take(emb.weight, indices.reshape(-1), axis=0).reshape(
        indices.shape + (embedding_dim,))
    assert out.shape == (8, 16, embedding_dim), out.shape
    assert out.dtype == emb.weight.dtype
    assert jnp.allclose(out, ref), "mismatch vs reference (one-hot path)"

    # Case 1b: same data through the HBM row-DMA path.
    flat = indices.reshape(-1)
    out_hbm = jax.block_until_ready(
        embedding_gather(emb.weight, flat, force_hbm=True))
    assert jnp.allclose(out_hbm, jnp.take(emb.weight, flat, axis=0)), \
        "mismatch vs reference (HBM DMA path)"

    # Case 2: vocabulary > one vocab chunk (exercises the chunked accumulation)
    # and a non-128-multiple embedding dim (exercises lane padding), both paths.
    emb2 = PallasEmbedding(700, embedding_dim=96, key=wkey2)
    idx2 = jax.random.randint(ikey2, (4, 40), 0, 700, dtype=jnp.int32)
    out2 = jax.block_until_ready(emb2(idx2))
    ref2 = jnp.take(emb2.weight, idx2.reshape(-1), axis=0).reshape(
        idx2.shape + (96,))
    assert out2.shape == (4, 40, 96), out2.shape
    assert jnp.allclose(out2, ref2), "mismatch vs reference (chunked one-hot)"
    out2_hbm = jax.block_until_ready(
        embedding_gather(emb2.weight, idx2.reshape(-1), force_hbm=True))
    assert jnp.allclose(out2_hbm, jnp.take(emb2.weight, idx2.reshape(-1), axis=0)), \
        "mismatch vs reference (HBM DMA path, padded D)"

    # indices=None path returns the full table.
    full = jax.block_until_ready(emb(None))
    assert full.shape == (num_embeddings, embedding_dim)

    # Tiny-n fallback path (plain jnp.take).
    small = jax.block_until_ready(emb(jnp.array([3, 1, 2], dtype=jnp.int32)))
    assert small.shape == (3, embedding_dim)
    assert jnp.allclose(small, emb.weight[jnp.array([3, 1, 2])])

    print("KERNEL_OK")
</pallas_src>

<mosaic_0001>
module attributes {stable_mosaic.version = 11 : i64} {
  func.func @_onehot_gather_kernel(%arg0: i32, %arg1: i32, %arg2: memref<64x1xi32, #tpu.memory_space<vmem>>, %arg3: memref<64x128xf32, #tpu.memory_space<vmem>>, %arg4: memref<64x128xf32, #tpu.memory_space<vmem>>, %arg5: memref<64x128xf32, #tpu.memory_space<vmem>>) attributes {dimension_semantics = [#tpu.dimension_semantics<parallel>, #tpu.dimension_semantics<arbitrary>], iteration_bounds = array<i64: 2, 1>, scalar_prefetch = 0 : i64, scratch_operands = 1 : i64, tpu.core_type = #tpu.core_type<tc>, window_params = [{transform_indices = @transform_0, window_bounds = array<i64: 64, 1>}, {transform_indices = @transform_1, window_bounds = array<i64: 64, 128>}, {transform_indices = @transform_2, window_bounds = array<i64: 64, 128>}]} {
    %c0_i32 = arith.constant 0 : i32
    %0 = arith.cmpi eq, %arg1, %c0_i32 : i32
    %1 = arith.extui %0 : i1 to i32
    %c0_i32_0 = arith.constant 0 : i32
    %2 = arith.cmpi ne, %1, %c0_i32_0 : i32
    scf.if %2 {
      %cst_10 = arith.constant 0.000000e+00 : f32
      %20 = vector.broadcast %cst_10 : f32 to vector<64x128xf32>
      %c0_11 = arith.constant 0 : index
      %c0_12 = arith.constant 0 : index
      %21 = vector.load %arg5[%c0_11, %c0_12] : memref<64x128xf32, #tpu.memory_space<vmem>>, vector<64x128xf32>
      tpu.vector_store %arg5[%c0_11, %c0_12], %20 {strides = array<i32>} : memref<64x128xf32, #tpu.memory_space<vmem>>, vector<64x128xf32>,
    } else {
    }
    %3 = tpu.iota {dimensions = array<i32: 1>} : vector<64x64xi32>
    %c64_i32 = arith.constant 64 : i32
    %4 = arith.muli %arg1, %c64_i32 : i32
    %5 = vector.broadcast %4 : i32 to vector<64x64xi32>
    %6 = arith.addi %3, %5 : vector<64x64xi32>
    %c0 = arith.constant 0 : index
    %c0_1 = arith.constant 0 : index
    %7 = vector.load %arg2[%c0, %c0_1] : memref<64x1xi32, #tpu.memory_space<vmem>>, vector<64x1xi32>
    %8 = vector.broadcast %7 : vector<64x1xi32> to vector<64x64xi32>
    %9 = arith.cmpi eq, %6, %8 : vector<64x64xi32>
    %10 = arith.extui %9 : vector<64x64xi1> to vector<64x64xi32>
    %11 = arith.sitofp %10 : vector<64x64xi32> to vector<64x64xf32>
    %c0_2 = arith.constant 0 : index
    %c0_3 = arith.constant 0 : index
    %12 = vector.load %arg5[%c0_2, %c0_3] : memref<64x128xf32, #tpu.memory_space<vmem>>, vector<64x128xf32>
    %c0_4 = arith.constant 0 : index
    %c0_5 = arith.constant 0 : index
    %13 = vector.load %arg3[%c0_4, %c0_5] : memref<64x128xf32, #tpu.memory_space<vmem>>, vector<64x128xf32>
    %cst = arith.constant dense<0.000000e+00> : vector<64x128xf32>
    %14 = tpu.matmul %11, %13, %cst {dimension_numbers = #tpu.dot_dimension_numbers<[1], [0], [0], [1], [0, 0, 1, 1], [], []>} : vector<64x64xf32>, vector<64x128xf32>, vector<64x128xf32> -> vector<64x128xf32>
    %15 = arith.addf %12, %14 : vector<64x128xf32>
    %c0_6 = arith.constant 0 : index
    %c0_7 = arith.constant 0 : index
    %16 = vector.load %arg5[%c0_6, %c0_7] : memref<64x128xf32, #tpu.memory_space<vmem>>, vector<64x128xf32>
    tpu.vector_store %arg5[%c0_6, %c0_7], %15 {strides = array<i32>} : memref<64x128xf32, #tpu.memory_space<vmem>>, vector<64x128xf32>,
    %c0_i32_8 = arith.constant 0 : i32
    %17 = arith.cmpi eq, %arg1, %c0_i32_8 : i32
    %18 = arith.extui %17 : i1 to i32
    %c0_i32_9 = arith.constant 0 : i32
    %19 = arith.cmpi ne, %18, %c0_i32_9 : i32
    scf.if %19 {
      %c0_10 = arith.constant 0 : index
      %c0_11 = arith.constant 0 : index
      %20 = vector.load %arg5[%c0_10, %c0_11] : memref<64x128xf32, #tpu.memory_space<vmem>>, vector<64x128xf32>
      %c0_12 = arith.constant 0 : index
      %c0_13 = arith.constant 0 : index
      %21 = vector.load %arg4[%c0_12, %c0_13] : memref<64x128xf32, #tpu.memory_space<vmem>>, vector<64x128xf32>
      tpu.vector_store %arg4[%c0_12, %c0_13], %20 {strides = array<i32>} : memref<64x128xf32, #tpu.memory_space<vmem>>, vector<64x128xf32>,
    } else {
    }
    return
  }
  func.func @transform_0(%arg0: i32, %arg1: i32) -> (i32, i32) {
    %c0_i32 = arith.constant 0 : i32
    %c0_i32_0 = arith.constant 0 : i32
    return %arg0, %c0_i32 : i32, i32
  }
  func.func @transform_1(%arg0: i32, %arg1: i32) -> (i32, i32) {
    %c0_i32 = arith.constant 0 : i32
    %c0_i32_0 = arith.constant 0 : i32
    return %arg1, %c0_i32 : i32, i32
  }
  func.func @transform_2(%arg0: i32, %arg1: i32) -> (i32, i32) {
    %c0_i32 = arith.constant 0 : i32
    %c0_i32_0 = arith.constant 0 : i32
    return %arg0, %c0_i32 : i32, i32
  }
}

</mosaic_0001>

<bundles_post_ra>
// kernel: embedding_gather.1
= control target key start
LH: loop header
LB: loop body
LE: loop exit
PB: predicated region body
PF: predicated region fallthrough
CT: control target
= control target key end

     0   :  { %7 = vsyncpa [#allocation4], 0  ;;  %s824_s0 = inlined_call_operand.vmem [shape: s32[128,1], index: 0, kind: input, shape index: {}]   ;;  %s825_s1 = inlined_call_operand.vmem [shape: f32[64,128], index: 1, kind: input, shape index: {}]   ;;  %s826_s2 = inlined_call_operand.hbm [shape: f32[128,128], index: 2, kind: output, shape index: {}]  }
   0x1   :  { %9 = vsyncpa [#allocation4 + $0x1], 0  ;;  %s686_s9 = smov 0   ;;  %s688_s10 = smov 0  }
   0x2   :  { %s690_s11 = smov 0   ;;  %s692_s12 = smov 0  }
   0x3   :  { %s694_s13 = smov 0   ;;  %s696_s14 = smov 0  }
   0x4 LB: > { %s470_s15 = sadd.s32 4294967295, %s665_s14   ;;  %s471_s16 = sadd.s32 4294967294, %s665_s14   ;;  %s665_s14 = sphi %s696_s14, %s15_s14   ;;  %s661_s13 = sphi %s694_s13, %s833_s13   ;;  %s657_s12 = sphi %s692_s12, %s832_s12   ;;  %s653_s11 = sphi %s690_s11, %s831_s11   ;;  %s649_s10 = sphi %s688_s10, %s830_s10   ;;  %s645_s9 = sphi %s686_s9, %s829_s9  }
   0x5   : > { %s27_s17 = sadd.s32 1, %s661_s13  ;;  %s86_s18 = sadd.s32 1, %s653_s11 }
   0x6   : > { %p29_p0 = scmp.ge.s32.totalorder %s27_s17, 2  ;;  %p96_p1 = scmp.ne.s32.totalorder %s653_s11, %s649_s10 }
   0x7   : > { %p97_p2 = scmp.eq.s32.totalorder %s470_s15, 1  ;;  %p102_p3 = scmp.ne.s32.totalorder %s649_s10, %s645_s9 }
   0x8   : > { %s835_s17 = smov (%p29_p0, %s27_s17), 0  ;;  %p103_p5 = scmp.eq.s32.totalorder %s471_s16, 1 }
   0x9   : > { %p726_p4 = por %p97_p2, %p96_p1  ;;  %s83_s20 = ssub.s32 %s661_s13, %s835_s17 }
   0xa   : > { %p475_p6 = scmp.ge.s32.totalorder %s665_s14, 1  ;;  %p84_p7 = scmp.eq.s32.totalorder %s83_s20, 0 }
   0xb   : > { %p733_p8 = por %p103_p5, %p102_p3  ;;  %p139_p9 = scmp.lt.s32.totalorder %s665_s14, 3 }
   0xc   : > { %s739_s22 = scalar_select %p84_p7, %s653_s11, %s86_s18  }
   0xd   : > { %p140_p10 = pnand %p475_p6, %p139_p9 }
   0xe   : > { %s477_s23 = sshll.u32 (!%p140_p10), %s657_s12, 3  ;;  %s163_s26 = sand.u32 (!%p140_p10), 1, %s649_s10  }
   0xf   : > { %143 = sbr.rel (%p140_p10) target bundleno = 298 (0x12a), region = 28  ;;  %p167_p11 = scmp.lt.s32.totalorder (!%p140_p10), %s477_s23, 15 }
  0x10   : > { %s476_s27 = sshll.u32 (!%p140_p10), %s163_s26, 6  ;;  %s500_s29 = sshll.u32 (!%p140_p10), %s657_s12, 6 }
  0x11   : > { %s165_s28 = scalar_lea.vmem (!%p140_p10), [#allocation3], %s476_s27  ;;  %s381_s4 = scalar_lea.hbm (!%p140_p10), %s826_s2, %s500_s29 }
  0x12   : > { %s384_s6 = sshll.u32 (!%p140_p10), %s381_s4, 4  ;;  %s370_s12 = scalar_lea.sflag (!%p140_p10), [#allocation4], %s163_s26  ;;  %s385_s6 = int_to_ptr.hbm [resolvable:$true] %s384_s6 }
  0x13   : > { %s601_s7 = sshra.s32 (!%p140_p10), %s385_s6, 4  ;;  %s607_s18 = scalar_lea.hbm (!%p140_p10), %s826_s2, 128  ;;  %s602_s7 = int_to_ptr.hbm [resolvable:$true] %s601_s7 }
  0x14   : > { %v267_v0 = vld [vmem:[%s825_s1 + $0x38] sm:$0xff]  ;;  %v667_v1 = vmov 0   ;;  %v266_v2 = vld [vmem:[%s825_s1 + $0x30] sm:$0xff]  ;;  %s837_s23 = smov (!%p167_p11, %s477_s23), 15  ;;  %v265_v3 = vld [vmem:[%s825_s1 + $0x28] sm:$0xff]  ;;  %v191_v17 = vlaneseq  ;;  %vm268_vm0 = vcmask 523264   ;;  %p608_p1 = scmp.lt.s32.totalorder %s602_s7, %s826_s2 }
  0x15   : > { %585 = vset.pattern.permute.xlu1 %v667_v1  ;;  %584 = vset.pattern.permute.xlu0 %v667_v1  ;;  %s478_s30 = sshll.u32 %s837_s23, 3  ;;  %v264_v4 = vld [vmem:[%s825_s1 + $0x20] sm:$0xff]  ;;  %v263_v7 = vld [vmem:[%s825_s1 + $0x18] sm:$0xff]  ;;  %v262_v9 = vld [vmem:[%s825_s1 + $0x10] sm:$0xff]  ;;  %v668_v21 = vmov 0.0   ;;  %s603_s8 = scalar_lea.hbm %s602_s7, 64 }
  0x16   : > { %586 = vset.pattern.permute.xlu2 %v667_v1  ;;  %502 = vmatpush.msra.mxu2 %v267_v0  ;;  %s754_s5 = scalar_lea.vmem %s824_s0, %s478_s30  ;;  %v261_v10 = vld [vmem:[%s825_s1 + $0x8] sm:$0xff]  ;;  %v260_v16 = vld [vmem:[%s825_s1] sm:$0xff]  ;;  %v192_v18 = vand.u32 127, %v191_v17  ;;  %p604_p12 = scmp.ne.s32.totalorder %s602_s7, %s603_s8 }
  0x17   : > { %301 = vmatpush.msra.mxu0 %v267_v0  ;;  %501 = vmatpush.msra.mxu1 %v267_v0  ;;  %v200_v5 = vld [vmem:[%s754_s5 + $0x20] sm:$0xff]  ;;  %v201_v8 = vld [vmem:[%s754_s5 + $0x28] sm:$0xff]  ;;  %v202_v11 = vld [vmem:[%s754_s5 + $0x30] sm:$0xff]  ;;  %p609_p2 = scmp.lt.s32.totalorder %s607_s18, %s603_s8 }
  0x18   : > { %505 = vmatpush.msra.mxu2 %v266_v2  ;;  %503 = vmatpush.msra.mxu3 %v267_v0  ;;  %v196_v6 = vld [vmem:[%s754_s5] sm:$0xff]  ;;  %v198_v12 = vld [vmem:[%s754_s5 + $0x10] sm:$0xff]  ;;  %v203_v13 = vld [vmem:[%s754_s5 + $0x38] sm:$0xff]  ;;  %p605_p13 = pnand %p604_p12, %p726_p4 }
  0x19   : > { %302 = vmatpush.msra.mxu0 %v266_v2  ;;  %504 = vmatpush.msra.mxu1 %v266_v2  ;;  %v197_v14 = vld [vmem:[%s754_s5 + $0x8] sm:$0xff]  ;;  %v199_v15 = vld [vmem:[%s754_s5 + $0x18] sm:$0xff]  ;;  %s382_s5 = sshll.u32 %s165_s28, 4  ;;  %p610_p3 = por %p609_p2, %p608_p1  ;;  %s383_s5 = int_to_ptr.vmem [resolvable:$true] %s382_s5 }
  0x1a   : > { %508 = vmatpush.msra.mxu2 %v265_v3  ;;  %506 = vmatpush.msra.mxu3 %v266_v2  ;;  %p606_p0 = pneg %p605_p13 }
  0x1b   : > { %303 = vmatpush.msra.mxu0 %v265_v3  ;;  %507 = vmatpush.msra.mxu1 %v265_v3 }
  0x1c   : > { %217 = vperm.xlu0 %584, %v200_v5   ;;  %205 = vperm.xlu1 %585, %v196_v6   ;;  %p611_p5 = pnand %p610_p3, %p606_p0 }
  0x1d   : > { %511 = vmatpush.msra.mxu2 %v264_v4  ;;  %509 = vmatpush.msra.mxu3 %v265_v3 }
  0x1e   : > { %220 = vperm.xlu2 %586, %v201_v8   ;;  %304 = vmatpush.msra.mxu0 %v264_v4 }
  0x1f   : > { %514 = vmatpush.msra.mxu2 %v263_v7  ;;  %510 = vmatpush.msra.mxu1 %v264_v4 }
  0x20   : > { %512 = vmatpush.msra.mxu3 %v264_v4  ;;  %305 = vmatpush.msra.mxu0 %v263_v7 }
  0x21   : > { %517 = vmatpush.msra.mxu2 %v262_v9  ;;  %513 = vmatpush.msra.mxu1 %v263_v7 }
  0x22   : > { %515 = vmatpush.msra.mxu3 %v263_v7  ;;  %306 = vmatpush.msra.mxu0 %v262_v9 }
  0x23   : > { %520 = vmatpush.msra.mxu2 %v261_v10  ;;  %516 = vmatpush.msra.mxu1 %v262_v9 }
  0x24   : > { %223 = vperm.xlu0 %584, %v202_v11   ;;  %211 = vperm.xlu1 %585, %v198_v12  }
  0x25   : > { %518 = vmatpush.msra.mxu3 %v262_v9  ;;  %307 = vmatpush.msra.mxu0 %v261_v10 }
  0x26   : > { %226 = vperm.xlu2 %586, %v203_v13   ;;  %519 = vmatpush.msra.mxu1 %v261_v10 }
  0x27   : > { %521 = vmatpush.msra.mxu3 %v261_v10  ;;  %523 = vmatpush.msra.mxu2 %v260_v16 }
  0x28   : > { %308 = vmatpush.msra.mxu0 %v260_v16  ;;  %522 = vmatpush.msra.mxu1 %v260_v16 }
  0x29   : > { %524 = vmatpush.msra.mxu3 %v260_v16 }
  0x2c   : > { %208 = vperm.xlu0 %584, %v197_v14   ;;  %214 = vperm.xlu1 %585, %v199_v15  }
  0x78   : > { %v221_v24 = vpop.permute.xlu2 %220 }
  0x79   : > { %vm233_vm3 = vcmp.eq.s32.totalorder %v192_v18, %v221_v24 }
  0x7a   : > { %v484_v25 = vsel %vm233_vm3, 1.0, %v668_v21 }
  0x80   : > { %v227_v30 = vpop.permute.xlu2 %226 }
  0x81   : > { %vm235_vm6 = vcmp.eq.s32.totalorder %v192_v18, %v227_v30 }
  0x82   : > { %v486_v35 = vsel %vm235_vm6, 1.0, %v668_v21 }
  0x8e   : > { %v218_v19 = vpop.permute.xlu0 %217  ;;  %v206_v20 = vpop.permute.xlu1 %205 }
  0x8f   : > { %vm232_vm1 = vcmp.eq.s32.totalorder %v192_v18, %v218_v19  ;;  %vm228_vm2 = vcmp.eq.s32.totalorder %v192_v18, %v206_v20 }
  0x90   : > { %v483_v22 = vsel %vm232_vm1, 1.0, %v668_v21  ;;  %v479_v23 = vsel %vm228_vm2, 1.0, %v668_v21 }
  0x91   : > { %491 = vmatmul.msk.f32.vlgmr.msra.gmra.mxu2 %vm268_vm0, %v483_v22  ;;  %487 = vmatmul.msk.f32.vlgmr.msra.gmra.mxu0 %vm268_vm0, %v479_v23 }
  0x96   : > { %v224_v26 = vpop.permute.xlu0 %223  ;;  %v212_v27 = vpop.permute.xlu1 %211 }
  0x97   : > { %vm234_vm4 = vcmp.eq.s32.totalorder %v192_v18, %v224_v26  ;;  %vm230_vm5 = vcmp.eq.s32.totalorder %v192_v18, %v212_v27 }
  0x98   : > { %v485_v28 = vsel %vm234_vm4, 1.0, %v668_v21  ;;  %v481_v29 = vsel %vm230_vm5, 1.0, %v668_v21 }
  0x99   : > { %489 = vmatmul.msk.f32.vlgmr.msra.gmra.mxu1 %vm268_vm0, %v481_v29  ;;  %492 = vmatmul.msk.f32.gmra.mxu2 %vm268_vm0, %v484_v25 }
  0x9a   : > { %493 = vmatmul.msk.f32.vlgmr.msra.gmra.mxu3 %vm268_vm0, %v485_v28 }
  0x9e   : > { %v209_v31 = vpop.permute.xlu0 %208  ;;  %v215_v32 = vpop.permute.xlu1 %214 }
  0x9f   : > { %vm229_vm7 = vcmp.eq.s32.totalorder %v192_v18, %v209_v31  ;;  %vm231_vm8 = vcmp.eq.s32.totalorder %v192_v18, %v215_v32 }
  0xa0   : > { %v480_v33 = vsel %vm229_vm7, 1.0, %v668_v21  ;;  %v482_v34 = vsel %vm231_vm8, 1.0, %v668_v21 }
  0xa1   : > { %488 = vmatmul.msk.f32.gmra.mxu0 %vm268_vm0, %v480_v33  ;;  %490 = vmatmul.msk.f32.gmra.mxu1 %vm268_vm0, %v482_v34 }
  0xa2   : > { %494 = vmatmul.msk.f32.gmra.mxu3 %vm268_vm0, %v486_v35 }
 0x10e   : > { %v310_v36 = vpop.f32.mrf.mxu0 }
 0x10f   : > { %361 = vst [vmem:[%s165_s28] sm:$0xff] %v310_v36 }
 0x114   : > { %v322_v37 = vpop.f32.mrf.mxu2 }
 0x115   : > { %365 = vst [vmem:[%s165_s28 + $0x20] sm:$0xff] %v322_v37 }
 0x116   : > { %v316_v38 = vpop.f32.mrf.mxu1 }
 0x117   : > { %363 = vst [vmem:[%s165_s28 + $0x10] sm:$0xff] %v316_v38 }
 0x11c   : > { %v325_v39 = vpop.f32.mrf.mxu2 }
 0x11d   : > { %366 = vst [vmem:[%s165_s28 + $0x28] sm:$0xff] %v325_v39  ;;  %v328_v40 = vpop.f32.mrf.mxu3 }
 0x11e   : > { %367 = vst [vmem:[%s165_s28 + $0x30] sm:$0xff] %v328_v40  ;;  %v313_v41 = vpop.f32.mrf.mxu0  ;;  %v319_v42 = vpop.f32.mrf.mxu1 }
 0x11f   : > { %362 = vst [vmem:[%s165_s28 + $0x8] sm:$0xff] %v313_v41 }
 0x120   : > { %364 = vst [vmem:[%s165_s28 + $0x18] sm:$0xff] %v319_v42 }
 0x125   : > { %v331_v43 = vpop.f32.mrf.mxu3 }
 0x126   : > { %368 = vst [vmem:[%s165_s28 + $0x38] sm:$0xff] %v331_v43 }
 0x127   : > { %614 = shalt.err (!%p611_p5)
}
 0x128   : > { %s669_s24 = smov 128   ;;  %s670_s25 = smov 8  }
 0x129   : > { %525 = dma.vmem_to_hbm [thread:$0]  (%p726_p4), %s383_s5, 1024, %s385_s6, %s370_s12, %s669_s24, %s669_s24, %s670_s25  }
 0x12a PF: > { %p531_p6 = scmp.ge.s32.totalorder %s665_s14, 2  ;;  %s399_s26 = sand.u32 1, %s645_s9  }
 0x12b   : > { %s400_s27 = scalar_lea.sflag [#allocation4], %s399_s26 }
 0x12c   : > { %p528_p7 = pnand %p531_p6, %p733_p8 }
 0x12e   : > { %p529_p9 = pneg %p528_p7 }
 0x130   : > { %640 = dma.done.wait (%p529_p9), %s400_s27, 1024  }
 0x131   : > { %642 = vsyncadd (%p529_p9), %s400_s27, 4294966272  ;;  %s15_s14 = sadd.s32 1, %s665_s14   ;;  %s829_s9 = smov %s649_s10 }
 0x132   : > { %p12_p10 = scmp.ge.s32.totalorder %s15_s14, 4   ;;  %s830_s10 = smov %s653_s11 }
 0x133   : > { %s831_s11 = smov %s739_s22  ;;  %s832_s12 = smov %s661_s13 }
 0x134   : > { %s833_s13 = smov %s835_s17  ;;  %14 = sbr.rel (!%p12_p10) target bundleno = 4 (0x4), region = 74 }
 0x139   :  { %406 = vsyncpa [#allocation4], 1 }
 0x13a   :  { %408 = vsyncpa [#allocation4 + $0x1], 1 }

</bundles_post_ra>
